<compile_context>
chip_gen: v7x
topology: tpu7x:2x2x1
jax: 0.10.0
libtpu: 0.0.40
codegen_flags: <defaults>
</compile_context>

<pallas_src>
import jax
import jax.numpy as jnp
from jax.experimental import pallas as pl
from jax.experimental.pallas import tpu as pltpu


# bf16 operands on v5e/v6e/v7x (MXU-native); accumulation/epilogue stay f32.
_MXU_DTYPE = jnp.bfloat16

# Lane tile for the conv GEMM grid (multiple of 128).  The kernel block is
# 4 * _LANE_TILE lanes wide (four fused pool phases).  Raise for very large
# batch on v6e; keep modest on v5e (16 MiB scoped VMEM) / v7x (64 MiB VMEM).
_LANE_TILE = 512


def _round_up(x, m):
    return (x + m - 1) // m * m


def _pad_to(a, target, axis):
    pad = target - a.shape[axis]
    if pad <= 0:
        return a
    widths = [(0, 0)] * a.ndim
    widths[axis] = (0, pad)
    return jnp.pad(a, widths)


# -----------------------------------------------------------------------------
# Fused conv + bias + ReLU + 2x2-maxpool kernel (one wide lane-dense GEMM)
# -----------------------------------------------------------------------------
def _conv_relu_pool_kernel(p_ref, w_ref, b_ref, o_ref):
    # p_ref: (K, 4*tn)  -- [phase0 | phase1 | phase2 | phase3] lane tiles
    # w_ref: (Cout, K), b_ref: (Cout, 1) f32, o_ref: (Cout, tn) f32
    tn = o_ref.shape[1]
    acc4 = jnp.dot(w_ref[...], p_ref[...], preferred_element_type=jnp.float32)
    acc = acc4[:, :tn]
    for p in range(1, 4):                       # static, vreg-aligned slices
        acc = jnp.maximum(acc, acc4[:, p * tn:(p + 1) * tn])
    # relu(maxpool(conv + b)) == maxpool(relu(conv + b)): same bias, monotone.
    o_ref[...] = jnp.maximum(acc + b_ref[...], 0.0).astype(o_ref.dtype)


def conv_relu_pool(x, w2, b2, kh, kw):
    """Conv2d(stride 1, no padding) + bias + ReLU + MaxPool2d(2).

    x : (Cin, B, H, W) channels-major activation (f32 or bf16)
    w2: (Cout, Cin*kh*kw)  bf16 (PyTorch weight.reshape(Cout, -1))
    b2: (Cout, 1)          f32
    returns (Cout, B, OH//2, OW//2) f32, channels-major.
    """
    Cin, B, H, W = x.shape
    Cout, K = w2.shape
    assert K == Cin * kh * kw
    OH, OW = H - kh + 1, W - kw + 1
    assert OH % 2 == 0 and OW % 2 == 0, "2x2 maxpool needs even conv output"
    PH, PW = OH // 2, OW // 2
    Mp = B * PH * PW

    # ---- JAX-side pooled im2col in transposed (K, Mp) layout, per phase ----
    shifts = [x[:, :, i:i + OH, j:j + OW] for i in range(kh) for j in range(kw)]
    shifts = jnp.stack(shifts, axis=1).reshape(K, B, OH, OW)   # (Cin,kh,kw)-major K
    phases = [shifts[:, :, di::2, dj::2].reshape(K, Mp)
              for di in range(2) for dj in range(2)]

    # Adaptive lane tile: keep stores lane-dense and grid_n >= 2 when possible
    # so the "parallel" axis can shard across v7x's two TensorCores.
    if Mp >= 256:
        tn = min(_LANE_TILE, _round_up((Mp + 1) // 2, 128))
    else:
        tn = 128
    mp_pad = _round_up(Mp, tn)
    grid_n = mp_pad // tn

    # Interleave phases per lane tile: columns of block n are
    # [phase0 tile n | phase1 tile n | phase2 tile n | phase3 tile n].
    patches = jnp.stack(phases, axis=0).astype(_MXU_DTYPE)      # (4, K, Mp)
    if mp_pad != Mp:
        patches = jnp.pad(patches, ((0, 0), (0, 0), (0, mp_pad - Mp)))
    patches = (patches.reshape(4, K, grid_n, tn)
               .transpose(1, 2, 0, 3)
               .reshape(K, grid_n * 4 * tn))

    elt = jnp.dtype(_MXU_DTYPE).itemsize
    flops = 2 * Cout * K * 4 * mp_pad
    bytes_accessed = ((K * 4 * mp_pad + Cout * K) * elt
                      + Cout * mp_pad * 4 + Cout * 4)

    out = pl.pallas_call(
        _conv_relu_pool_kernel,
        out_shape=jax.ShapeDtypeStruct((Cout, mp_pad), jnp.float32),
        grid=(grid_n,),
        in_specs=[
            pl.BlockSpec((K, 4 * tn), lambda n: (0, n)),
            pl.BlockSpec((Cout, K), lambda n: (0, 0)),
            pl.BlockSpec((Cout, 1), lambda n: (0, 0)),
        ],
        out_specs=pl.BlockSpec((Cout, tn), lambda n: (0, n)),
        compiler_params=pltpu.CompilerParams(
            dimension_semantics=("parallel",)),
        cost_estimate=pl.CostEstimate(
            flops=int(flops), transcendentals=0,
            bytes_accessed=int(bytes_accessed)),
    )(patches, w2, b2)

    out = out[:, :Mp]                            # drop lane padding
    return out.reshape(Cout, B, PH, PW)          # channels-major, no transpose


# -----------------------------------------------------------------------------
# Fused FC stack: fc1 + ReLU -> fc2 + ReLU -> fc3 in a single kernel,
# tiled over batch, hidden dims pre-padded to lane width.
# -----------------------------------------------------------------------------
def _fc_stack_kernel(x_ref, w1_ref, b1_ref, w2_ref, b2_ref, w3_ref, b3_ref,
                     o_ref):
    h = jnp.dot(x_ref[...], w1_ref[...],
                preferred_element_type=jnp.float32) + b1_ref[...]
    h = jnp.maximum(h, 0.0)
    h = jnp.dot(h.astype(w2_ref.dtype), w2_ref[...],
                preferred_element_type=jnp.float32) + b2_ref[...]
    h = jnp.maximum(h, 0.0)
    o = jnp.dot(h.astype(w3_ref.dtype), w3_ref[...],
                preferred_element_type=jnp.float32) + b3_ref[...]
    o_ref[...] = o.astype(o_ref.dtype)


def fc_stack(x, w1, b1, w2, b2, w3, b3):
    """x:(B,400); w1:(400,128) b1:(1,128); w2:(128,128) b2:(1,128);
    w3:(128,C) b3:(1,C)  ->  (B,C).  Hidden padding is zero -> numerics match."""
    B, D = x.shape
    C = w3.shape[1]
    TB = B if B <= 256 else 256
    b_pad = _round_up(B, TB)
    x = x.astype(_MXU_DTYPE)
    if b_pad != B:
        x = jnp.pad(x, ((0, b_pad - B), (0, 0)))
    grid_b = b_pad // TB

    weights = (w1, b1, w2, b2, w3, b3)
    out = pl.pallas_call(
        _fc_stack_kernel,
        out_shape=jax.ShapeDtypeStruct((b_pad, C), jnp.float32),
        grid=(grid_b,),
        in_specs=[pl.BlockSpec((TB, D), lambda i: (i, 0))] + [
            pl.BlockSpec(w.shape, lambda i: (0, 0)) for w in weights],
        out_specs=pl.BlockSpec((TB, C), lambda i: (i, 0)),
        compiler_params=pltpu.CompilerParams(
            dimension_semantics=("parallel",)),
    )(x, *weights)
    return out[:B] if b_pad != B else out


# -----------------------------------------------------------------------------
# Parameters and forward pass
# -----------------------------------------------------------------------------
def init_lenet_params(key, num_class):
    """PyTorch-layout LeNet parameters (deterministic)."""
    ks = jax.random.split(key, 10)
    s = 0.05
    return {
        "conv1_w": jax.random.normal(ks[0], (6, 3, 5, 5), jnp.float32) * s,
        "conv1_b": jax.random.normal(ks[1], (6,), jnp.float32) * s,
        "conv2_w": jax.random.normal(ks[2], (16, 6, 5, 5), jnp.float32) * s,
        "conv2_b": jax.random.normal(ks[3], (16,), jnp.float32) * s,
        "fc1_w": jax.random.normal(ks[4], (120, 400), jnp.float32) * s,
        "fc1_b": jax.random.normal(ks[5], (120,), jnp.float32) * s,
        "fc2_w": jax.random.normal(ks[6], (84, 120), jnp.float32) * s,
        "fc2_b": jax.random.normal(ks[7], (84,), jnp.float32) * s,
        "fc3_w": jax.random.normal(ks[8], (num_class, 84), jnp.float32) * s,
        "fc3_b": jax.random.normal(ks[9], (num_class,), jnp.float32) * s,
    }


def prepare_params(p):
    """One-time conversion to kernel-friendly layouts:
    conv weights flattened to (Cout, Cin*kh*kw) bf16, biases (Cout,1)/(1,N) f32,
    FC weights pre-transposed to (in, out) bf16 with hidden dims zero-padded
    to lane width (120->128, 84->128)."""
    h1 = _round_up(p["fc1_w"].shape[0], 128)   # 120 -> 128
    h2 = _round_up(p["fc2_w"].shape[0], 128)   # 84  -> 128
    fc1_w = _pad_to(p["fc1_w"].T, h1, 1)                       # (400, 128)
    fc1_b = _pad_to(p["fc1_b"].reshape(1, -1), h1, 1)          # (1, 128)
    fc2_w = _pad_to(_pad_to(p["fc2_w"].T, h1, 0), h2, 1)       # (128, 128)
    fc2_b = _pad_to(p["fc2_b"].reshape(1, -1), h2, 1)          # (1, 128)
    fc3_w = _pad_to(p["fc3_w"].T, h2, 0)                       # (128, C)
    fc3_b = p["fc3_b"].reshape(1, -1)                          # (1, C)
    return {
        "conv1_w": p["conv1_w"].reshape(p["conv1_w"].shape[0], -1).astype(_MXU_DTYPE),
        "conv1_b": p["conv1_b"].reshape(-1, 1).astype(jnp.float32),
        "conv2_w": p["conv2_w"].reshape(p["conv2_w"].shape[0], -1).astype(_MXU_DTYPE),
        "conv2_b": p["conv2_b"].reshape(-1, 1).astype(jnp.float32),
        "fc1_w": fc1_w.astype(_MXU_DTYPE), "fc1_b": fc1_b.astype(jnp.float32),
        "fc2_w": fc2_w.astype(_MXU_DTYPE), "fc2_b": fc2_b.astype(jnp.float32),
        "fc3_w": fc3_w.astype(_MXU_DTYPE), "fc3_b": fc3_b.astype(jnp.float32),
    }


def lenet_forward(kp, x):
    # Single NCHW -> channels-major transpose; stays channels-major between
    # the two conv stages (no NCHW round trip).
    out = x.transpose(1, 0, 2, 3)                                  # (3, B, 32, 32)
    out = conv_relu_pool(out, kp["conv1_w"], kp["conv1_b"], 5, 5)  # (6, B, 14, 14)
    out = conv_relu_pool(out, kp["conv2_w"], kp["conv2_b"], 5, 5)  # (16, B, 5, 5)
    B = out.shape[1]
    out = out.transpose(1, 0, 2, 3).reshape(B, -1)  # (B,400), matches torch .view
    return fc_stack(out, kp["fc1_w"], kp["fc1_b"],
                    kp["fc2_w"], kp["fc2_b"],
                    kp["fc3_w"], kp["fc3_b"])


def _reference_forward(p, x):
    """Pure-JAX f32 reference mirroring the PyTorch module (sanity check)."""
    hp = jax.lax.Precision.HIGHEST

    def conv(x, w, b):
        y = jax.lax.conv_general_dilated(
            x, w, window_strides=(1, 1), padding="VALID",
            dimension_numbers=("NCHW", "OIHW", "NCHW"), precision=hp)
        return jax.nn.relu(y + b.reshape(1, -1, 1, 1))

    def pool(x):
        B, C, H, W = x.shape
        return x.reshape(B, C, H // 2, 2, W // 2, 2).max(axis=(3, 5))

    out = pool(conv(x, p["conv1_w"], p["conv1_b"]))
    out = pool(conv(out, p["conv2_w"], p["conv2_b"]))
    out = out.reshape(out.shape[0], -1)
    out = jax.nn.relu(jnp.dot(out, p["fc1_w"].T, precision=hp) + p["fc1_b"])
    out = jax.nn.relu(jnp.dot(out, p["fc2_w"].T, precision=hp) + p["fc2_b"])
    return jnp.dot(out, p["fc3_w"].T, precision=hp) + p["fc3_b"]


if __name__ == "__main__":
    num_class = 10
    key = jax.random.PRNGKey(0)
    k_param, k_input = jax.random.split(key)

    params = init_lenet_params(k_param, num_class)
    kparams = prepare_params(params)           # one-time layout conversion
    # LeNet needs 3x32x32 input so the flatten yields 400 features.
    x = jax.random.normal(k_input, (2, 3, 32, 32), jnp.float32)

    fwd = jax.jit(lenet_forward)
    out = fwd(kparams, x)
    jax.block_until_ready(out)
    assert out.shape == (2, num_class), out.shape

    # Sanity-check against a pure-JAX f32 reference.  Kernel uses bf16 MXU
    # operands with f32 accumulation; observed error is ~1e-3, well inside
    # the 2e-2 tolerance.
    ref = _reference_forward(params, x)
    err = float(jnp.max(jnp.abs(out - ref)))
    assert jnp.allclose(out, ref, rtol=2e-2, atol=2e-2), err

    print("KERNEL_OK")
</pallas_src>

<mosaic_0001>
module attributes {stable_mosaic.version = 11 : i64} {
  func.func @_conv_relu_pool_kernel(%arg0: i32, %arg1: memref<75x1024xbf16, #tpu.memory_space<vmem>>, %arg2: memref<6x75xbf16, #tpu.memory_space<vmem>>, %arg3: memref<6x1xf32, #tpu.memory_space<vmem>>, %arg4: memref<6x256xf32, #tpu.memory_space<vmem>>) attributes {dimension_semantics = [#tpu.dimension_semantics<parallel>], iteration_bounds = array<i64: 2>, scalar_prefetch = 0 : i64, scratch_operands = 0 : i64, tpu.core_type = #tpu.core_type<tc>, window_params = [{transform_indices = @transform_0, window_bounds = array<i64: 75, 1024>}, {pipeline_mode = #tpu.pipeline_mode<synchronous>, transform_indices = @transform_1, window_bounds = array<i64: 6, 75>}, {pipeline_mode = #tpu.pipeline_mode<synchronous>, transform_indices = @transform_2, window_bounds = array<i64: 6, 1>}, {transform_indices = @transform_3, window_bounds = array<i64: 6, 256>}]} {
    %c0 = arith.constant 0 : index
    %c0_0 = arith.constant 0 : index
    %0 = vector.load %arg2[%c0, %c0_0] : memref<6x75xbf16, #tpu.memory_space<vmem>>, vector<6x75xbf16>
    %c0_1 = arith.constant 0 : index
    %c0_2 = arith.constant 0 : index
    %1 = vector.load %arg1[%c0_1, %c0_2] : memref<75x1024xbf16, #tpu.memory_space<vmem>>, vector<75x1024xbf16>
    %cst = arith.constant dense<0.000000e+00> : vector<6x1024xf32>
    %2 = tpu.matmul %0, %1, %cst {dimension_numbers = #tpu.dot_dimension_numbers<[1], [0], [0], [1], [0, 0, 1, 1], [], []>} : vector<6x75xbf16>, vector<75x1024xbf16>, vector<6x1024xf32> -> vector<6x1024xf32>
    %3 = vector.extract_strided_slice %2 {offsets = [0, 0], sizes = [6, 256], strides = [1, 1]} : vector<6x1024xf32> to vector<6x256xf32>
    %4 = vector.extract_strided_slice %2 {offsets = [0, 256], sizes = [6, 256], strides = [1, 1]} : vector<6x1024xf32> to vector<6x256xf32>
    %5 = arith.maximumf %3, %4 : vector<6x256xf32>
    %6 = vector.extract_strided_slice %2 {offsets = [0, 512], sizes = [6, 256], strides = [1, 1]} : vector<6x1024xf32> to vector<6x256xf32>
    %7 = arith.maximumf %5, %6 : vector<6x256xf32>
    %8 = vector.extract_strided_slice %2 {offsets = [0, 768], sizes = [6, 256], strides = [1, 1]} : vector<6x1024xf32> to vector<6x256xf32>
    %9 = arith.maximumf %7, %8 : vector<6x256xf32>
    %c0_3 = arith.constant 0 : index
    %c0_4 = arith.constant 0 : index
    %10 = vector.load %arg3[%c0_3, %c0_4] : memref<6x1xf32, #tpu.memory_space<vmem>>, vector<6x1xf32>
    %11 = vector.broadcast %10 : vector<6x1xf32> to vector<6x256xf32>
    %12 = arith.addf %9, %11 : vector<6x256xf32>
    %cst_5 = arith.constant 0.000000e+00 : f32
    %13 = vector.broadcast %cst_5 : f32 to vector<6x256xf32>
    %14 = arith.maximumf %12, %13 : vector<6x256xf32>
    %c0_6 = arith.constant 0 : index
    %c0_7 = arith.constant 0 : index
    %15 = vector.load %arg4[%c0_6, %c0_7] : memref<6x256xf32, #tpu.memory_space<vmem>>, vector<6x256xf32>
    tpu.vector_store %arg4[%c0_6, %c0_7], %14 {strides = array<i32>} : memref<6x256xf32, #tpu.memory_space<vmem>>, vector<6x256xf32>,
    return
  }
  func.func @transform_0(%arg0: i32) -> (i32, i32) {
    %c0_i32 = arith.constant 0 : i32
    %c0_i32_0 = arith.constant 0 : i32
    return %c0_i32, %arg0 : i32, i32
  }
  func.func @transform_1(%arg0: i32) -> (i32, i32) {
    %c0_i32 = arith.constant 0 : i32
    %c0_i32_0 = arith.constant 0 : i32
    %c0_i32_1 = arith.constant 0 : i32
    return %c0_i32, %c0_i32_0 : i32, i32
  }
  func.func @transform_2(%arg0: i32) -> (i32, i32) {
    %c0_i32 = arith.constant 0 : i32
    %c0_i32_0 = arith.constant 0 : i32
    %c0_i32_1 = arith.constant 0 : i32
    return %c0_i32, %c0_i32_0 : i32, i32
  }
  func.func @transform_3(%arg0: i32) -> (i32, i32) {
    %c0_i32 = arith.constant 0 : i32
    %c0_i32_0 = arith.constant 0 : i32
    return %c0_i32, %arg0 : i32, i32
  }
}

module attributes {stable_mosaic.version = 11 : i64} {
  func.func @_conv_relu_pool_kernel(%arg0: i32, %arg1: memref<150x512xbf16, #tpu.memory_space<vmem>>, %arg2: memref<16x150xbf16, #tpu.memory_space<vmem>>, %arg3: memref<16x1xf32, #tpu.memory_space<vmem>>, %arg4: memref<16x128xf32, #tpu.memory_space<vmem>>) attributes {dimension_semantics = [#tpu.dimension_semantics<parallel>], iteration_bounds = array<i64: 1>, scalar_prefetch = 0 : i64, scratch_operands = 0 : i64, tpu.core_type = #tpu.core_type<tc>, window_params = [{transform_indices = @transform_0, window_bounds = array<i64: 150, 512>}, {pipeline_mode = #tpu.pipeline_mode<synchronous>, transform_indices = @transform_1, window_bounds = array<i64: 16, 150>}, {pipeline_mode = #tpu.pipeline_mode<synchronous>, transform_indices = @transform_2, window_bounds = array<i64: 16, 1>}, {transform_indices = @transform_3, window_bounds = array<i64: 16, 128>}]} {
    %c0 = arith.constant 0 : index
    %c0_0 = arith.constant 0 : index
    %0 = vector.load %arg2[%c0, %c0_0] : memref<16x150xbf16, #tpu.memory_space<vmem>>, vector<16x150xbf16>
    %c0_1 = arith.constant 0 : index
    %c0_2 = arith.constant 0 : index
    %1 = vector.load %arg1[%c0_1, %c0_2] : memref<150x512xbf16, #tpu.memory_space<vmem>>, vector<150x512xbf16>
    %cst = arith.constant dense<0.000000e+00> : vector<16x512xf32>
    %2 = tpu.matmul %0, %1, %cst {dimension_numbers = #tpu.dot_dimension_numbers<[1], [0], [0], [1], [0, 0, 1, 1], [], []>} : vector<16x150xbf16>, vector<150x512xbf16>, vector<16x512xf32> -> vector<16x512xf32>
    %3 = vector.extract_strided_slice %2 {offsets = [0, 0], sizes = [16, 128], strides = [1, 1]} : vector<16x512xf32> to vector<16x128xf32>
    %4 = vector.extract_strided_slice %2 {offsets = [0, 128], sizes = [16, 128], strides = [1, 1]} : vector<16x512xf32> to vector<16x128xf32>
    %5 = arith.maximumf %3, %4 : vector<16x128xf32>
    %6 = vector.extract_strided_slice %2 {offsets = [0, 256], sizes = [16, 128], strides = [1, 1]} : vector<16x512xf32> to vector<16x128xf32>
    %7 = arith.maximumf %5, %6 : vector<16x128xf32>
    %8 = vector.extract_strided_slice %2 {offsets = [0, 384], sizes = [16, 128], strides = [1, 1]} : vector<16x512xf32> to vector<16x128xf32>
    %9 = arith.maximumf %7, %8 : vector<16x128xf32>
    %c0_3 = arith.constant 0 : index
    %c0_4 = arith.constant 0 : index
    %10 = vector.load %arg3[%c0_3, %c0_4] : memref<16x1xf32, #tpu.memory_space<vmem>>, vector<16x1xf32>
    %11 = vector.broadcast %10 : vector<16x1xf32> to vector<16x128xf32>
    %12 = arith.addf %9, %11 : vector<16x128xf32>
    %cst_5 = arith.constant 0.000000e+00 : f32
    %13 = vector.broadcast %cst_5 : f32 to vector<16x128xf32>
    %14 = arith.maximumf %12, %13 : vector<16x128xf32>
    %c0_6 = arith.constant 0 : index
    %c0_7 = arith.constant 0 : index
    %15 = vector.load %arg4[%c0_6, %c0_7] : memref<16x128xf32, #tpu.memory_space<vmem>>, vector<16x128xf32>
    tpu.vector_store %arg4[%c0_6, %c0_7], %14 {strides = array<i32>} : memref<16x128xf32, #tpu.memory_space<vmem>>, vector<16x128xf32>,
    return
  }
  func.func @transform_0(%arg0: i32) -> (i32, i32) {
    %c0_i32 = arith.constant 0 : i32
    %c0_i32_0 = arith.constant 0 : i32
    return %c0_i32, %arg0 : i32, i32
  }
  func.func @transform_1(%arg0: i32) -> (i32, i32) {
    %c0_i32 = arith.constant 0 : i32
    %c0_i32_0 = arith.constant 0 : i32
    %c0_i32_1 = arith.constant 0 : i32
    return %c0_i32, %c0_i32_0 : i32, i32
  }
  func.func @transform_2(%arg0: i32) -> (i32, i32) {
    %c0_i32 = arith.constant 0 : i32
    %c0_i32_0 = arith.constant 0 : i32
    %c0_i32_1 = arith.constant 0 : i32
    return %c0_i32, %c0_i32_0 : i32, i32
  }
  func.func @transform_3(%arg0: i32) -> (i32, i32) {
    %c0_i32 = arith.constant 0 : i32
    %c0_i32_0 = arith.constant 0 : i32
    return %c0_i32, %arg0 : i32, i32
  }
}

module attributes {stable_mosaic.version = 11 : i64} {
  func.func @_fc_stack_kernel(%arg0: i32, %arg1: memref<2x400xbf16, #tpu.memory_space<vmem>>, %arg2: memref<400x128xbf16, #tpu.memory_space<vmem>>, %arg3: memref<1x128xf32, #tpu.memory_space<vmem>>, %arg4: memref<128x128xbf16, #tpu.memory_space<vmem>>, %arg5: memref<1x128xf32, #tpu.memory_space<vmem>>, %arg6: memref<128x10xbf16, #tpu.memory_space<vmem>>, %arg7: memref<1x10xf32, #tpu.memory_space<vmem>>, %arg8: memref<2x10xf32, #tpu.memory_space<vmem>>) attributes {dimension_semantics = [#tpu.dimension_semantics<parallel>], iteration_bounds = array<i64: 1>, scalar_prefetch = 0 : i64, scratch_operands = 0 : i64, tpu.core_type = #tpu.core_type<tc>, window_params = [{transform_indices = @transform_0, window_bounds = array<i64: 2, 400>}, {pipeline_mode = #tpu.pipeline_mode<synchronous>, transform_indices = @transform_1, window_bounds = array<i64: 400, 128>}, {pipeline_mode = #tpu.pipeline_mode<synchronous>, transform_indices = @transform_2, window_bounds = array<i64: 1, 128>}, {pipeline_mode = #tpu.pipeline_mode<synchronous>, transform_indices = @transform_3, window_bounds = array<i64: 128, 128>}, {pipeline_mode = #tpu.pipeline_mode<synchronous>, transform_indices = @transform_4, window_bounds = array<i64: 1, 128>}, {pipeline_mode = #tpu.pipeline_mode<synchronous>, transform_indices = @transform_5, window_bounds = array<i64: 128, 10>}, {pipeline_mode = #tpu.pipeline_mode<synchronous>, transform_indices = @transform_6, window_bounds = array<i64: 1, 10>}, {transform_indices = @transform_7, window_bounds = array<i64: 2, 10>}]} {
    %c0 = arith.constant 0 : index
    %c0_0 = arith.constant 0 : index
    %0 = vector.load %arg1[%c0, %c0_0] : memref<2x400xbf16, #tpu.memory_space<vmem>>, vector<2x400xbf16>
    %c0_1 = arith.constant 0 : index
    %c0_2 = arith.constant 0 : index
    %1 = vector.load %arg2[%c0_1, %c0_2] : memref<400x128xbf16, #tpu.memory_space<vmem>>, vector<400x128xbf16>
    %cst = arith.constant dense<0.000000e+00> : vector<2x128xf32>
    %2 = tpu.matmul %0, %1, %cst {dimension_numbers = #tpu.dot_dimension_numbers<[1], [0], [0], [1], [0, 0, 1, 1], [], []>} : vector<2x400xbf16>, vector<400x128xbf16>, vector<2x128xf32> -> vector<2x128xf32>
    %c0_3 = arith.constant 0 : index
    %c0_4 = arith.constant 0 : index
    %3 = vector.load %arg3[%c0_3, %c0_4] : memref<1x128xf32, #tpu.memory_space<vmem>>, vector<1x128xf32>
    %4 = vector.broadcast %3 : vector<1x128xf32> to vector<2x128xf32>
    %5 = arith.addf %2, %4 : vector<2x128xf32>
    %cst_5 = arith.constant 0.000000e+00 : f32
    %6 = vector.broadcast %cst_5 : f32 to vector<2x128xf32>
    %7 = arith.maximumf %5, %6 : vector<2x128xf32>
    %8 = arith.truncf %7 : vector<2x128xf32> to vector<2x128xbf16>
    %c0_6 = arith.constant 0 : index
    %c0_7 = arith.constant 0 : index
    %9 = vector.load %arg4[%c0_6, %c0_7] : memref<128x128xbf16, #tpu.memory_space<vmem>>, vector<128x128xbf16>
    %cst_8 = arith.constant dense<0.000000e+00> : vector<2x128xf32>
    %10 = tpu.matmul %8, %9, %cst_8 {dimension_numbers = #tpu.dot_dimension_numbers<[1], [0], [0], [1], [0, 0, 1, 1], [], []>} : vector<2x128xbf16>, vector<128x128xbf16>, vector<2x128xf32> -> vector<2x128xf32>
    %c0_9 = arith.constant 0 : index
    %c0_10 = arith.constant 0 : index
    %11 = vector.load %arg5[%c0_9, %c0_10] : memref<1x128xf32, #tpu.memory_space<vmem>>, vector<1x128xf32>
    %12 = vector.broadcast %11 : vector<1x128xf32> to vector<2x128xf32>
    %13 = arith.addf %10, %12 : vector<2x128xf32>
    %cst_11 = arith.constant 0.000000e+00 : f32
    %14 = vector.broadcast %cst_11 : f32 to vector<2x128xf32>
    %15 = arith.maximumf %13, %14 : vector<2x128xf32>
    %16 = arith.truncf %15 : vector<2x128xf32> to vector<2x128xbf16>
    %c0_12 = arith.constant 0 : index
    %c0_13 = arith.constant 0 : index
    %17 = vector.load %arg6[%c0_12, %c0_13] : memref<128x10xbf16, #tpu.memory_space<vmem>>, vector<128x10xbf16>
    %cst_14 = arith.constant dense<0.000000e+00> : vector<2x10xf32>
    %18 = tpu.matmul %16, %17, %cst_14 {dimension_numbers = #tpu.dot_dimension_numbers<[1], [0], [0], [1], [0, 0, 1, 1], [], []>} : vector<2x128xbf16>, vector<128x10xbf16>, vector<2x10xf32> -> vector<2x10xf32>
    %c0_15 = arith.constant 0 : index
    %c0_16 = arith.constant 0 : index
    %19 = vector.load %arg7[%c0_15, %c0_16] : memref<1x10xf32, #tpu.memory_space<vmem>>, vector<1x10xf32>
    %20 = vector.broadcast %19 : vector<1x10xf32> to vector<2x10xf32>
    %21 = arith.addf %18, %20 : vector<2x10xf32>
    %c0_17 = arith.constant 0 : index
    %c0_18 = arith.constant 0 : index
    %22 = vector.load %arg8[%c0_17, %c0_18] : memref<2x10xf32, #tpu.memory_space<vmem>>, vector<2x10xf32>
    tpu.vector_store %arg8[%c0_17, %c0_18], %21 {strides = array<i32>} : memref<2x10xf32, #tpu.memory_space<vmem>>, vector<2x10xf32>,
    return
  }
  func.func @transform_0(%arg0: i32) -> (i32, i32) {
    %c0_i32 = arith.constant 0 : i32
    %c0_i32_0 = arith.constant 0 : i32
    return %arg0, %c0_i32 : i32, i32
  }
  func.func @transform_1(%arg0: i32) -> (i32, i32) {
    %c0_i32 = arith.constant 0 : i32
    %c0_i32_0 = arith.constant 0 : i32
    %c0_i32_1 = arith.constant 0 : i32
    return %c0_i32, %c0_i32_0 : i32, i32
  }
  func.func @transform_2(%arg0: i32) -> (i32, i32) {
    %c0_i32 = arith.constant 0 : i32
    %c0_i32_0 = arith.constant 0 : i32
    %c0_i32_1 = arith.constant 0 : i32
    return %c0_i32, %c0_i32_0 : i32, i32
  }
  func.func @transform_3(%arg0: i32) -> (i32, i32) {
    %c0_i32 = arith.constant 0 : i32
    %c0_i32_0 = arith.constant 0 : i32
    %c0_i32_1 = arith.constant 0 : i32
    return %c0_i32, %c0_i32_0 : i32, i32
  }
  func.func @transform_4(%arg0: i32) -> (i32, i32) {
    %c0_i32 = arith.constant 0 : i32
    %c0_i32_0 = arith.constant 0 : i32
    %c0_i32_1 = arith.constant 0 : i32
    return %c0_i32, %c0_i32_0 : i32, i32
  }
  func.func @transform_5(%arg0: i32) -> (i32, i32) {
    %c0_i32 = arith.constant 0 : i32
    %c0_i32_0 = arith.constant 0 : i32
    %c0_i32_1 = arith.constant 0 : i32
    return %c0_i32, %c0_i32_0 : i32, i32
  }
  func.func @transform_6(%arg0: i32) -> (i32, i32) {
    %c0_i32 = arith.constant 0 : i32
    %c0_i32_0 = arith.constant 0 : i32
    %c0_i32_1 = arith.constant 0 : i32
    return %c0_i32, %c0_i32_0 : i32, i32
  }
  func.func @transform_7(%arg0: i32) -> (i32, i32) {
    %c0_i32 = arith.constant 0 : i32
    %c0_i32_0 = arith.constant 0 : i32
    return %arg0, %c0_i32 : i32, i32
  }
}

</mosaic_0001>

<bundles_post_ra>
// kernel: lenet_forward.3
= control target key start
LH: loop header
LB: loop body
LE: loop exit
PB: predicated region body
PF: predicated region fallthrough
CT: control target
= control target key end

     0   :  { %s912_s12 = smov 0   ;;  %s914_s13 = smov 0   ;;  %s1115_s0 = inlined_call_operand.vmem [shape: bf16[75,2048], index: 0, kind: input, shape index: {}]   ;;  %s1116_s1 = inlined_call_operand.vmem [shape: bf16[6,75], index: 1, kind: input, shape index: {}]   ;;  %s1117_s2 = inlined_call_operand.vmem [shape: f32[6,1], index: 2, kind: input, shape index: {}]   ;;  %s1118_s3 = inlined_call_operand.vmem [shape: f32[6,512], index: 3, kind: output, shape index: {}]  }
   0x1   :  { %s916_s14 = smov 0  }
   0x2 LB: > { %s781_s15 = sadd.s32 4294967295, %s888_s14   ;;  %s929_s16 = sadd.s32 1, %s888_s14   ;;  %s888_s14 = sphi %s916_s14, %s1121_s14   ;;  %s884_s13 = sphi %s914_s13, %s1120_s13   ;;  %s880_s12 = sphi %s912_s12, %s1119_s12  }
   0x3   : > { %s17_s17 = ssub.s32 %s888_s14, %s929_s16  ;;  %s20_s18 = sadd.s32 1, %s884_s13 }
   0x4   : > { %p18_p0 = scmp.eq.s32.totalorder %s17_s17, 0  ;;  %p27_p1 = scmp.ne.s32.totalorder %s884_s13, %s880_s12 }
   0x5   : > { %p28_p2 = scmp.eq.s32.totalorder %s888_s14, 0  ;;  %p784_p4 = scmp.ge.s32.totalorder %s888_s14, 2 }
   0x6   : > { %s938_s19 = scalar_select %p18_p0, %s884_s13, %s20_s18  }
   0x7   : > { %p29_p3 = por %p28_p2, %p27_p1  ;;  %127 = sbr.rel (%p784_p4) target bundleno = 39 (0x27), region = 24 }
   0xe   : > { %130 = sbr.rel (!%p29_p3) target bundleno = 39 (0x27), region = 28  ;;  %s132_s20 = sand.u32 (%p29_p3), 1, %s884_s13  }
   0xf   : > { %s836_s21 = sshll.u32 (%p29_p3), %s888_s14, 5  ;;  %s837_s22 = smul.u32 (%p29_p3), 320, %s132_s20 }
  0x10   : > { %s946_s25 = scalar_lea.vmem (%p29_p3), %s1115_s0, %s836_s21 }
  0x11   : > { %v150_v0 = vld [vmem:[%s946_s25] sm:$0xff] (%p29_p3)  ;;  %v152_v1 = vld [vmem:[%s946_s25 + $0x8] sm:$0xff] (%p29_p3)  ;;  %v154_v2 = vld [vmem:[%s946_s25 + $0x10] sm:$0xff] (%p29_p3)  ;;  %s954_s26 = scalar_lea.vmem (%p29_p3), [#allocation2], %s837_s22 }
  0x12   : > { %v156_v3 = vld [vmem:[%s946_s25 + $0x18] sm:$0xff] (%p29_p3)  ;;  %v158_v4 = vld [vmem:[%s946_s25 + $0x40] sm:$0xff] (%p29_p3)  ;;  %v160_v5 = vld [vmem:[%s946_s25 + $0x48] sm:$0xff] (%p29_p3)  ;;  %151 = vst [vmem:[%s954_s26] sm:$0xff] (%p29_p3), %v150_v0 }
  0x13   : > { %153 = vst [vmem:[%s954_s26 + $0x8] sm:$0xff] (%p29_p3), %v152_v1  ;;  %155 = vst [vmem:[%s954_s26 + $0x10] sm:$0xff] (%p29_p3), %v154_v2  ;;  %v162_v6 = vld [vmem:[%s946_s25 + $0x50] sm:$0xff] (%p29_p3)  ;;  %v164_v7 = vld [vmem:[%s946_s25 + $0x58] sm:$0xff] (%p29_p3) }
  0x14   : > { %157 = vst [vmem:[%s954_s26 + $0x18] sm:$0xff] (%p29_p3), %v156_v3  ;;  %159 = vst [vmem:[%s954_s26 + $0x20] sm:$0xff] (%p29_p3), %v158_v4  ;;  %v166_v8 = vld [vmem:[%s946_s25 + $0x80] sm:$0xff] (%p29_p3)  ;;  %v168_v9 = vld [vmem:[%s946_s25 + $0x88] sm:$0xff] (%p29_p3) }
  0x15   : > { %161 = vst [vmem:[%s954_s26 + $0x28] sm:$0xff] %v160_v5  ;;  %163 = vst [vmem:[%s954_s26 + $0x30] sm:$0xff] %v162_v6  ;;  %v170_v10 = vld [vmem:[%s946_s25 + $0x90] sm:$0xff]  ;;  %v172_v11 = vld [vmem:[%s946_s25 + $0x98] sm:$0xff] }
  0x16   : > { %165 = vst [vmem:[%s954_s26 + $0x38] sm:$0xff] %v164_v7  ;;  %167 = vst [vmem:[%s954_s26 + $0x40] sm:$0xff] %v166_v8  ;;  %v174_v12 = vld [vmem:[%s946_s25 + $0xc0] sm:$0xff]  ;;  %v176_v13 = vld [vmem:[%s946_s25 + $0xc8] sm:$0xff] }
  0x17   : > { %169 = vst [vmem:[%s954_s26 + $0x48] sm:$0xff] %v168_v9  ;;  %171 = vst [vmem:[%s954_s26 + $0x50] sm:$0xff] %v170_v10  ;;  %v178_v14 = vld [vmem:[%s946_s25 + $0xd0] sm:$0xff]  ;;  %v180_v15 = vld [vmem:[%s946_s25 + $0xd8] sm:$0xff] }
  0x18   : > { %173 = vst [vmem:[%s954_s26 + $0x58] sm:$0xff] %v172_v11  ;;  %175 = vst [vmem:[%s954_s26 + $0x60] sm:$0xff] %v174_v12  ;;  %v182_v16 = vld [vmem:[%s946_s25 + $0x100] sm:$0xff]  ;;  %v184_v17 = vld [vmem:[%s946_s25 + $0x108] sm:$0xff] }
  0x19   : > { %177 = vst [vmem:[%s954_s26 + $0x68] sm:$0xff] %v176_v13  ;;  %179 = vst [vmem:[%s954_s26 + $0x70] sm:$0xff] %v178_v14  ;;  %v186_v18 = vld [vmem:[%s946_s25 + $0x110] sm:$0xff]  ;;  %v188_v19 = vld [vmem:[%s946_s25 + $0x118] sm:$0xff] }
  0x1a   : > { %181 = vst [vmem:[%s954_s26 + $0x78] sm:$0xff] %v180_v15  ;;  %183 = vst [vmem:[%s954_s26 + $0x80] sm:$0xff] %v182_v16  ;;  %v190_v20 = vld [vmem:[%s946_s25 + $0x140] sm:$0xff]  ;;  %v192_v21 = vld [vmem:[%s946_s25 + $0x148] sm:$0xff] }
  0x1b   : > { %185 = vst [vmem:[%s954_s26 + $0x88] sm:$0xff] %v184_v17  ;;  %187 = vst [vmem:[%s954_s26 + $0x90] sm:$0xff] %v186_v18  ;;  %v194_v22 = vld [vmem:[%s946_s25 + $0x150] sm:$0xff]  ;;  %v196_v23 = vld [vmem:[%s946_s25 + $0x158] sm:$0xff] }
  0x1c   : > { %189 = vst [vmem:[%s954_s26 + $0x98] sm:$0xff] %v188_v19  ;;  %191 = vst [vmem:[%s954_s26 + $0xa0] sm:$0xff] %v190_v20  ;;  %v198_v24 = vld [vmem:[%s946_s25 + $0x180] sm:$0xff]  ;;  %v200_v25 = vld [vmem:[%s946_s25 + $0x188] sm:$0xff] }
  0x1d   : > { %193 = vst [vmem:[%s954_s26 + $0xa8] sm:$0xff] %v192_v21  ;;  %195 = vst [vmem:[%s954_s26 + $0xb0] sm:$0xff] %v194_v22  ;;  %v202_v26 = vld [vmem:[%s946_s25 + $0x190] sm:$0xff]  ;;  %v204_v27 = vld [vmem:[%s946_s25 + $0x198] sm:$0xff] }
  0x1e   : > { %197 = vst [vmem:[%s954_s26 + $0xb8] sm:$0xff] %v196_v23  ;;  %199 = vst [vmem:[%s954_s26 + $0xc0] sm:$0xff] %v198_v24  ;;  %v206_v28 = vld [vmem:[%s946_s25 + $0x1c0] sm:$0xff]  ;;  %v208_v29 = vld [vmem:[%s946_s25 + $0x1c8] sm:$0xff] }
  0x1f   : > { %201 = vst [vmem:[%s954_s26 + $0xc8] sm:$0xff] %v200_v25  ;;  %203 = vst [vmem:[%s954_s26 + $0xd0] sm:$0xff] %v202_v26  ;;  %v210_v30 = vld [vmem:[%s946_s25 + $0x1d0] sm:$0xff]  ;;  %v212_v31 = vld [vmem:[%s946_s25 + $0x1d8] sm:$0xff] }
  0x20   : > { %205 = vst [vmem:[%s954_s26 + $0xd8] sm:$0xff] %v204_v27  ;;  %207 = vst [vmem:[%s954_s26 + $0xe0] sm:$0xff] %v206_v28  ;;  %v214_v32 = vld [vmem:[%s946_s25 + $0x200] sm:$0xff]  ;;  %v216_v33 = vld [vmem:[%s946_s25 + $0x208] sm:$0xff] }
  0x21   : > { %209 = vst [vmem:[%s954_s26 + $0xe8] sm:$0xff] %v208_v29  ;;  %211 = vst [vmem:[%s954_s26 + $0xf0] sm:$0xff] %v210_v30  ;;  %v218_v34 = vld [vmem:[%s946_s25 + $0x210] sm:$0xff]  ;;  %v220_v35 = vld [vmem:[%s946_s25 + $0x218] sm:$0xff] }
  0x22   : > { %213 = vst [vmem:[%s954_s26 + $0xf8] sm:$0xff] %v212_v31  ;;  %215 = vst [vmem:[%s954_s26 + $0x100] sm:$0xff] %v214_v32  ;;  %v222_v36 = vld [vmem:[%s946_s25 + $0x240] sm:$0xff]  ;;  %v224_v37 = vld [vmem:[%s946_s25 + $0x248] sm:$0xff] }
  0x23   : > { %217 = vst [vmem:[%s954_s26 + $0x108] sm:$0xff] %v216_v33  ;;  %219 = vst [vmem:[%s954_s26 + $0x110] sm:$0xff] %v218_v34  ;;  %v226_v38 = vld [vmem:[%s946_s25 + $0x250] sm:$0xff]  ;;  %v228_v39 = vld [vmem:[%s946_s25 + $0x258] sm:$0xff] }
  0x24   : > { %221 = vst [vmem:[%s954_s26 + $0x118] sm:$0xff] %v220_v35  ;;  %223 = vst [vmem:[%s954_s26 + $0x120] sm:$0xff] %v222_v36 }
  0x25   : > { %225 = vst [vmem:[%s954_s26 + $0x128] sm:$0xff] %v224_v37  ;;  %227 = vst [vmem:[%s954_s26 + $0x130] sm:$0xff] %v226_v38 }
  0x26   : > { %229 = vst [vmem:[%s954_s26 + $0x138] sm:$0xff] %v228_v39 }
  0x27 PF: > { %p787_p5 = scmp.ge.s32.totalorder %s888_s14, 1  ;;  %p234_p6 = scmp.lt.s32.totalorder %s888_s14, 3 }
  0x29   : > { %p235_p7 = pnand %p787_p5, %p234_p6 }
  0x2a   : > { %s241_s27 = sand.u32 (!%p235_p7), 1, %s880_s12   ;;  %v890_v40 = vmov (!%p235_p7), 0   ;;  %v707_v41 = vld [vmem:[%s1117_s2] sm:$0x3f] (!%p235_p7)  ;;  %vm509_vm0 = vcmask (!%p235_p7), 1044480   ;;  %vm510_vm1 = vcmask (!%p235_p7), 1045504  }
  0x2b   : > { %238 = sbr.rel (%p235_p7) target bundleno = 313 (0x139), region = 51  ;;  %569 = vmatprep.mubr.bf16.mxu0 (!%p235_p7), %v890_v40  ;;  %610 = vmatprep.mubr.bf16.mxu1 (!%p235_p7), %v890_v40  ;;  %v891_v6 = vmov (!%p235_p7), 65535   ;;  %v272_v35 = vld [vmem:[%s1116_s1] sm:$0x7] (!%p235_p7)  ;;  %vm505_vm2 = vcmask (!%p235_p7), 613376   ;;  %s788_s7 = sshll.u32 (!%p235_p7), %s781_s15, 1 }
  0x2c   : > { %s838_s28 = smul.u32 (!%p235_p7), 320, %s241_s27  ;;  %865 = vset.pattern.permute.xlu0 (!%p235_p7), %v890_v40  ;;  %v511_v7 = vsel (!%p235_p7), %vm509_vm0, 4294967295, %v891_v6  ;;  %p266_p8 = scmp.lt.s32.totalorder (!%p235_p7), %s788_s7, 3 }
  0x2d   : > { %710 = vperm.xlu0 (!%p235_p7), %865, %v707_v41   ;;  %v1061_v15 = vsel (!%p235_p7), %vm510_vm1, %v511_v7, 0 }
  0x2e   : > { %s1039_s4 = scalar_lea.vmem (!%p235_p7), [#allocation2], %s838_s28 }
  0x2f   : > { %v273_v42 = vld [vmem:[%s1039_s4] sm:$0xff] (!%p235_p7)  ;;  %v274_v44 = vld [vmem:[%s1039_s4 + $0x8] sm:$0xff] (!%p235_p7)  ;;  %v275_v23 = vld [vmem:[%s1039_s4 + $0x10] sm:$0xff] (!%p235_p7) }
  0x30   : > { %v277_v43 = vld [vmem:[%s1039_s4 + $0x20] sm:$0xff] (!%p235_p7)  ;;  %v278_v46 = vld [vmem:[%s1039_s4 + $0x28] sm:$0xff] (!%p235_p7)  ;;  %v279_v24 = vld [vmem:[%s1039_s4 + $0x30] sm:$0xff] (!%p235_p7) }
  0x31   : > { %v791_v45 = vcombine.high (!%p235_p7), %v273_v42, %v277_v43  ;;  %v790_v47 = vcombine.low (!%p235_p7), %v273_v42, %v277_v43  ;;  %v281_v48 = vld [vmem:[%s1039_s4 + $0x40] sm:$0xff] (!%p235_p7)  ;;  %v793_v50 = vcombine.high (!%p235_p7), %v274_v44, %v278_v46  ;;  %v792_v51 = vcombine.low (!%p235_p7), %v274_v44, %v278_v46  ;;  %v282_v53 = vld [vmem:[%s1039_s4 + $0x48] sm:$0xff] (!%p235_p7)  ;;  %v276_v25 = vld [vmem:[%s1039_s4 + $0x18] sm:$0xff] (!%p235_p7) }
  0x32   : > { %v285_v49 = vld [vmem:[%s1039_s4 + $0x60] sm:$0xff]  ;;  %v286_v54 = vld [vmem:[%s1039_s4 + $0x68] sm:$0xff]  ;;  %v280_v26 = vld [vmem:[%s1039_s4 + $0x38] sm:$0xff]  ;;  %v795_v29 = vcombine.high %v275_v23, %v279_v24  ;;  %v794_v36 = vcombine.low %v275_v23, %v279_v24  ;;  %s1123_s7 = smov (!%p266_p8, %s788_s7), 3 }
  0x33   : > { %v799_v52 = vcombine.high %v281_v48, %v285_v49  ;;  %v289_v55 = vld [vmem:[%s1039_s4 + $0x80] sm:$0xff]  ;;  %537 = vmatprep.subr.bf16.mxu0 %v791_v45  ;;  %v801_v56 = vcombine.high %v282_v53, %v286_v54  ;;  %v290_v58 = vld [vmem:[%s1039_s4 + $0x88] sm:$0xff]  ;;  %578 = vmatprep.subr.bf16.mxu1 %v793_v50  ;;  %v798_v60 = vcombine.low %v281_v48, %v285_v49  ;;  %v283_v31 = vld [vmem:[%s1039_s4 + $0x50] sm:$0xff]  ;;  %s789_s8 = sshll.u32 %s1123_s7, 3 }
  0x34   : > { %v293_v57 = vld [vmem:[%s1039_s4 + $0xa0] sm:$0xff]  ;;  %v294_v59 = vld [vmem:[%s1039_s4 + $0xa8] sm:$0xff]  ;;  %538 = vmatpush1.bf16.msra.mxu0 %v790_v47  ;;  %579 = vmatpush1.bf16.msra.mxu1 %v792_v51  ;;  %v800_v61 = vcombine.low %v282_v53, %v286_v54  ;;  %v797_v30 = vcombine.high %v276_v25, %v280_v26  ;;  %v287_v32 = vld [vmem:[%s1039_s4 + $0x70] sm:$0xff]  ;;  %v796_v37 = vcombine.low %v276_v25, %v280_v26  ;;  %s269_s11 = scalar_lea.vmem %s1118_s3, %s789_s8 }
  0x35   : > { %539 = vmatprep.subr.bf16.mxu0 %v799_v52  ;;  %v807_v62 = vcombine.high %v289_v55, %v293_v57  ;;  %v297_v63 = vld [vmem:[%s1039_s4 + $0xc0] sm:$0xff]  ;;  %580 = vmatprep.subr.bf16.mxu1 %v801_v56  ;;  %v809_v1 = vcombine.high %v290_v58, %v294_v59  ;;  %v298_v2 = vld [vmem:[%s1039_s4 + $0xc8] sm:$0xff]  ;;  %v806_v10 = vcombine.low %v289_v55, %v293_v57  ;;  %v284_v33 = vld [vmem:[%s1039_s4 + $0x58] sm:$0xff] }
  0x36   : > { %v301_v0 = vld [vmem:[%s1039_s4 + $0xe0] sm:$0xff]  ;;  %v302_v5 = vld [vmem:[%s1039_s4 + $0xe8] sm:$0xff]  ;;  %v808_v11 = vcombine.low %v290_v58, %v294_v59  ;;  %v288_v34 = vld [vmem:[%s1039_s4 + $0x78] sm:$0xff]  ;;  %v803_v38 = vcombine.high %v283_v31, %v287_v32  ;;  %v802_v45 = vcombine.low %v283_v31, %v287_v32 }
  0x37   : > { %v305_v3 = vld [vmem:[%s1039_s4 + $0x100] sm:$0xff]  ;;  %v306_v8 = vld [vmem:[%s1039_s4 + $0x108] sm:$0xff]  ;;  %v815_v12 = vcombine.high %v297_v63, %v301_v0  ;;  %v817_v14 = vcombine.high %v298_v2, %v302_v5  ;;  %v814_v17 = vcombine.low %v297_v63, %v301_v0  ;;  %v816_v19 = vcombine.low %v298_v2, %v302_v5  ;;  %v291_v41 = vld [vmem:[%s1039_s4 + $0x90] sm:$0xff] }
  0x38   : > { %v309_v4 = vld [vmem:[%s1039_s4 + $0x120] sm:$0x33]  ;;  %v310_v9 = vld [vmem:[%s1039_s4 + $0x128] sm:$0x33]  ;;  %540 = vmatpush1.bf16.msra.mxu0 %v798_v60  ;;  %581 = vmatpush1.bf16.msra.mxu1 %v800_v61  ;;  %v805_v39 = vcombine.high %v284_v33, %v288_v34  ;;  %v295_v42 = vld [vmem:[%s1039_s4 + $0xb0] sm:$0xff]  ;;  %v804_v46 = vcombine.low %v284_v33, %v288_v34 }
  0x39   : > { %541 = vmatprep.subr.bf16.mxu0 %v807_v62  ;;  %v823_v13 = vcombine.high %v305_v3, %v309_v4  ;;  %582 = vmatprep.subr.bf16.mxu1 %v809_v1  ;;  %v825_v16 = vcombine.high %v306_v8, %v310_v9  ;;  %v822_v18 = vcombine.low %v305_v3, %v309_v4  ;;  %v292_v43 = vld [vmem:[%s1039_s4 + $0x98] sm:$0xff]  ;;  %v299_v48 = vld [vmem:[%s1039_s4 + $0xd0] sm:$0xff] }
  0x3a   : > { %v824_v21 = vcombine.low %v306_v8, %v310_v9  ;;  %v296_v44 = vld [vmem:[%s1039_s4 + $0xb8] sm:$0xff]  ;;  %v811_v47 = vcombine.high %v291_v41, %v295_v42  ;;  %v303_v49 = vld [vmem:[%s1039_s4 + $0xf0] sm:$0xff]  ;;  %v810_v57 = vcombine.low %v291_v41, %v295_v42 }
  0x3b   : > { %v517_v20 = vand.u32 %v823_v13, %v1061_v15  ;;  %v523_v22 = vand.u32 %v825_v16, %v1061_v15  ;;  %v514_v27 = vand.u32 %v822_v18, %v1061_v15  ;;  %v813_v50 = vcombine.high %v292_v43, %v296_v44  ;;  %v300_v51 = vld [vmem:[%s1039_s4 + $0xd8] sm:$0xff]  ;;  %v307_v52 = vld [vmem:[%s1039_s4 + $0x110] sm:$0xff] }
  0x3c   : > { %542 = vmatpush1.bf16.msra.mxu0 %v806_v10  ;;  %583 = vmatpush1.bf16.msra.mxu1 %v808_v11  ;;  %v520_v28 = vand.u32 %v824_v21, %v1061_v15  ;;  %v311_v53 = vld [vmem:[%s1039_s4 + $0x130] sm:$0x33]  ;;  %v304_v54 = vld [vmem:[%s1039_s4 + $0xf8] sm:$0xff]  ;;  %v812_v58 = vcombine.low %v292_v43, %v296_v44  ;;  %v819_v59 = vcombine.high %v299_v48, %v303_v49 }
  0x3d   : > { %543 = vmatprep.subr.bf16.mxu0 %v815_v12  ;;  %584 = vmatprep.subr.bf16.mxu1 %v817_v14  ;;  %v308_v55 = vld [vmem:[%s1039_s4 + $0x118] sm:$0xff]  ;;  %v827_v60 = vcombine.high %v307_v52, %v311_v53  ;;  %v821_v61 = vcombine.high %v300_v51, %v304_v54  ;;  %v818_v63 = vcombine.low %v299_v48, %v303_v49 }
  0x3e   : > { %v312_v56 = vld [vmem:[%s1039_s4 + $0x138] sm:$0x33]  ;;  %v826_v0 = vcombine.low %v307_v52, %v311_v53  ;;  %v820_v1 = vcombine.low %v300_v51, %v304_v54 }
  0x3f   : > { %v829_v62 = vcombine.high %v308_v55, %v312_v56  ;;  %v529_v2 = vand.u32 %v827_v60, %v1061_v15  ;;  %v828_v3 = vcombine.low %v308_v55, %v312_v56 }
  0x40   : > { %544 = vmatpush1.bf16.msra.mxu0 %v814_v17  ;;  %585 = vmatpush1.bf16.msra.mxu1 %v816_v19  ;;  %v526_v4 = vand.u32 %v826_v0, %v1061_v15 }
  0x41   : > { %545 = vmatprep.subr.bf16.mxu0 %v517_v20  ;;  %586 = vmatprep.subr.bf16.mxu1 %v523_v22  ;;  %v532_v5 = vand.u32 %v828_v3, %v1061_v15 }
  0x44   : > { %546 = vmatpush1.bf16.msra.mxu0 %v514_v27  ;;  %587 = vmatpush1.bf16.msra.mxu1 %v520_v28 }
  0x45   : > { %619 = vmatprep.subr.bf16.mxu0 %v795_v29  ;;  %660 = vmatprep.subr.bf16.mxu1 %v797_v30 }
  0x47   : > { %830 = vmatmul.mubr.msk.bf16.vlgmr.msra.gmra.mrb[0].mxu0 %vm505_vm2, %v272_v35  ;;  %831 = vmatmul.mubr.msk.bf16.vlgmr.msra.gmra.mrb[0].mxu1 %vm505_vm2, %v272_v35 }
  0x48   : > { %620 = vmatpush1.bf16.msra.mxu0 %v794_v36  ;;  %661 = vmatpush1.bf16.msra.mxu1 %v796_v37 }
  0x49   : > { %621 = vmatprep.subr.bf16.mxu0 %v803_v38  ;;  %662 = vmatprep.subr.bf16.mxu1 %v805_v39 }
  0x4a   : > { %651 = vmatprep.mubr.bf16.mxu0 %v890_v40  ;;  %692 = vmatprep.mubr.bf16.mxu1 %v890_v40  ;;  %v535_v40 = vand.u32 %v829_v62, %v1061_v15 }
  0x4c   : > { %622 = vmatpush1.bf16.msra.mxu0 %v802_v45  ;;  %663 = vmatpush1.bf16.msra.mxu1 %v804_v46 }
  0x4d   : > { %623 = vmatprep.subr.bf16.mxu0 %v811_v47  ;;  %664 = vmatprep.subr.bf16.mxu1 %v813_v50 }
  0x50   : > { %624 = vmatpush1.bf16.msra.mxu0 %v810_v57  ;;  %665 = vmatpush1.bf16.msra.mxu1 %v812_v58 }
  0x51   : > { %625 = vmatprep.subr.bf16.mxu0 %v819_v59  ;;  %666 = vmatprep.subr.bf16.mxu1 %v821_v61 }
  0x54   : > { %626 = vmatpush1.bf16.msra.mxu0 %v818_v63  ;;  %667 = vmatpush1.bf16.msra.mxu1 %v820_v1 }
  0x55   : > { %627 = vmatprep.subr.bf16.mxu0 %v529_v2  ;;  %668 = vmatprep.subr.bf16.mxu1 %v535_v40 }
  0x58   : > { %628 = vmatpush1.bf16.msra.mxu0 %v526_v4  ;;  %669 = vmatpush1.bf16.msra.mxu1 %v532_v5 }
  0x5b   : > { %832 = vmatmul.mubr.msk.bf16.vlgmr.msra.gmra.mrb[4].mxu0 %vm505_vm2, %v272_v35  ;;  %833 = vmatmul.mubr.msk.bf16.vlgmr.msra.gmra.mrb[4].mxu1 %vm505_vm2, %v272_v35 }
  0xac   : > { %v711_v17 = vpop.permute.xlu0 %710 }
 0x11a   : > { %v571_v6 = vpop.f32.mrb[0].mxu0  ;;  %v612_v7 = vpop.f32.mrb[0].mxu1 }
 0x11b   : > { %v573_v8 = vpop.f32.mrb[1].mxu0  ;;  %v701_v9 = vmax.f32 %v571_v6, %v612_v7  ;;  %v614_v10 = vpop.f32.mrb[1].mxu1 }
 0x11c   : > { %v575_v11 = vpop.f32.mrb[2].mxu0  ;;  %v702_v12 = vmax.f32 %v573_v8, %v614_v10  ;;  %v616_v13 = vpop.f32.mrb[2].mxu1 }
 0x11d   : > { %v576_v14 = vpop.f32.mrb[3].mxu0  ;;  %v617_v16 = vpop.f32.mrb[3].mxu1 }
 0x12e   : > { %v653_v15 = vpop.f32.mrb[4].mxu0  ;;  %v694_v19 = vpop.f32.mrb[4].mxu1 }
 0x12f   : > { %v703_v18 = vmax.f32 %v701_v9, %v653_v15  ;;  %v655_v20 = vpop.f32.mrb[5].mxu0  ;;  %v696_v22 = vpop.f32.mrb[5].mxu1 }
 0x130   : > { %v704_v21 = vmax.f32 %v702_v12, %v655_v20  ;;  %v657_v23 = vpop.f32.mrb[6].mxu0  ;;  %v698_v25 = vpop.f32.mrb[6].mxu1 }
 0x131   : > { %v705_v24 = vmax.f32 %v703_v18, %v694_v19  ;;  %v658_v26 = vpop.f32.mrb[7].mxu0  ;;  %v699_v28 = vpop.f32.mrb[7].mxu1 }
 0x132   : > { %v706_v27 = vmax.f32 %v704_v21, %v696_v22 }
 0x133   : > { %v713_v29 = vadd.f32 %v711_v17, %v705_v24 }
 0x134   : > { %v714_v30 = vadd.f32 %v711_v17, %v706_v27 }
 0x135   : > { %v715_v31 = vmax.f32 %v713_v29, 0.0 }
 0x136   : > { %v716_v32 = vmax.f32 %v714_v30, 0.0 }
 0x137   : > { %717 = vst [vmem:[%s269_s11] sm:$0x3f] %v715_v31 }
 0x138   : > { %718 = vst [vmem:[%s269_s11 + $0x8] sm:$0x3f] %v716_v32 }
 0x139 PF: > { %p10_p9 = scmp.ge.s32.totalorder %s929_s16, 4   ;;  %s1119_s12 = smov %s884_s13 }
 0x13a   : > { %s1120_s13 = smov %s938_s19  ;;  %s1121_s14 = smov %s929_s16 }
 0x13b   :  { %12 = sbr.rel (!%p10_p9) target bundleno = 2 (0x2), region = 90 }

// kernel: lenet_forward.4
= control target key start
LH: loop header
LB: loop body
LE: loop exit
PB: predicated region body
PF: predicated region fallthrough
CT: control target
= control target key end

     0   :  { %v494_v1 = vmov 0   ;;  %vm254_vm0 = vcmask 179200   ;;  %vm258_vm1 = vcmask 1042432   ;;  %s647_s0 = inlined_call_operand.vmem [shape: bf16[150,512], index: 0, kind: input, shape index: {}]   ;;  %s648_s1 = inlined_call_operand.vmem [shape: bf16[16,150], index: 1, kind: input, shape index: {}]   ;;  %s649_s2 = inlined_call_operand.vmem [shape: f32[16,1], index: 2, kind: input, shape index: {}]   ;;  %s650_s3 = inlined_call_operand.vmem [shape: f32[16,128], index: 3, kind: output, shape index: {}]  }
   0x1   :  { %v433_v0 = vld [vmem:[%s647_s0 + $0x4] ss:$16 sps:$4 sm:$0xff]   ;;  %432 = vset.pattern.permute.xlu0 %v494_v1  ;;  %v435_v2 = vld [vmem:[%s647_s0 + $0xc] ss:$16 sps:$4 sm:$0xff]   ;;  %v437_v3 = vld [vmem:[%s647_s0] ss:$16 sps:$4 sm:$0xff]  }
   0x2   :  { %271 = vmatprep.subr.bf16.mxu0 %v433_v0  ;;  %v438_v4 = vld [vmem:[%s647_s0 + $0x8] ss:$16 sps:$4 sm:$0xff]   ;;  %314 = vmatprep.subr.bf16.mxu1 %v435_v2  ;;  %v439_v5 = vld [vmem:[%s647_s0 + $0x24] ss:$16 sps:$4 sm:$0xff]   ;;  %v441_v6 = vld [vmem:[%s647_s0 + $0x2c] ss:$16 sps:$4 sm:$0xff]  }
   0x3   :  { %272 = vmatpush1.bf16.msra.mxu0 %v437_v3  ;;  %315 = vmatpush1.bf16.msra.mxu1 %v438_v4  ;;  %v443_v7 = vld [vmem:[%s647_s0 + $0x20] ss:$16 sps:$4 sm:$0xff]   ;;  %v444_v8 = vld [vmem:[%s647_s0 + $0x28] ss:$16 sps:$4 sm:$0xff]   ;;  %v445_v9 = vld [vmem:[%s647_s0 + $0x44] ss:$16 sps:$4 sm:$0xff]  }
   0x4   :  { %273 = vmatprep.subr.bf16.mxu0 %v439_v5  ;;  %316 = vmatprep.subr.bf16.mxu1 %v441_v6  ;;  %v447_v10 = vld [vmem:[%s647_s0 + $0x4c] ss:$16 sps:$4 sm:$0xff]   ;;  %v449_v11 = vld [vmem:[%s647_s0 + $0x40] ss:$16 sps:$4 sm:$0xff]   ;;  %v450_v12 = vld [vmem:[%s647_s0 + $0x48] ss:$16 sps:$4 sm:$0xff]  }
   0x5   :  { %v451_v13 = vld [vmem:[%s647_s0 + $0x64] ss:$16 sps:$4 sm:$0xff]   ;;  %v453_v14 = vld [vmem:[%s647_s0 + $0x6c] ss:$16 sps:$4 sm:$0xff]   ;;  %v455_v15 = vld [vmem:[%s647_s0 + $0x60] ss:$16 sps:$4 sm:$0xff]  }
   0x6   :  { %v456_v16 = vld [vmem:[%s647_s0 + $0x68] ss:$16 sps:$4 sm:$0xff]   ;;  %v457_v17 = vld [vmem:[%s647_s0 + $0x84] ss:$16 sps:$4 sm:$0xff]   ;;  %v459_v18 = vld [vmem:[%s647_s0 + $0x8c] ss:$16 sps:$4 sm:$0xff]  }
   0x7   :  { %274 = vmatpush1.bf16.msra.mxu0 %v443_v7  ;;  %317 = vmatpush1.bf16.msra.mxu1 %v444_v8  ;;  %v461_v19 = vld [vmem:[%s647_s0 + $0x80] ss:$16 sps:$4 sm:$0xff]   ;;  %v462_v20 = vld [vmem:[%s647_s0 + $0x88] ss:$16 sps:$4 sm:$0xff]   ;;  %v463_v21 = vld [vmem:[%s647_s0 + $0xa4] ss:$16 sps:$4 sm:$0xff]  }
   0x8   :  { %275 = vmatprep.subr.bf16.mxu0 %v445_v9  ;;  %318 = vmatprep.subr.bf16.mxu1 %v447_v10  ;;  %v465_v22 = vld [vmem:[%s647_s0 + $0xac] ss:$16 sps:$4 sm:$0xff]   ;;  %v467_v23 = vld [vmem:[%s647_s0 + $0xa0] ss:$16 sps:$4 sm:$0xff]   ;;  %v468_v24 = vld [vmem:[%s647_s0 + $0xa8] ss:$16 sps:$4 sm:$0xff]  }
   0x9   :  { %v469_v25 = vld [vmem:[%s647_s0 + $0xc4] ss:$16 sps:$4 sm:$0xff]   ;;  %v471_v26 = vld [vmem:[%s647_s0 + $0xcc] ss:$16 sps:$4 sm:$0xff]   ;;  %v473_v27 = vld [vmem:[%s647_s0 + $0xc0] ss:$16 sps:$4 sm:$0xff]  }
   0xa   :  { %v474_v28 = vld [vmem:[%s647_s0 + $0xc8] ss:$16 sps:$4 sm:$0xff]   ;;  %v475_v29 = vld [vmem:[%s647_s0 + $0xe4] ss:$16 sps:$4 sm:$0xff]   ;;  %v477_v30 = vld [vmem:[%s647_s0 + $0xec] ss:$16 sps:$4 sm:$0xff]  }
   0xb   :  { %276 = vmatpush1.bf16.msra.mxu0 %v449_v11  ;;  %319 = vmatpush1.bf16.msra.mxu1 %v450_v12  ;;  %v493_v31 = vld [vmem:[%s648_s1 + $0x4] ss:$8 sps:$4 sm:$0xff]   ;;  %v479_v33 = vld [vmem:[%s647_s0 + $0xe0] ss:$16 sps:$4 sm:$0xff]   ;;  %v480_v34 = vld [vmem:[%s647_s0 + $0xe8] ss:$16 sps:$4 sm:$0xff]  }
   0xc   :  { %277 = vmatprep.subr.bf16.mxu0 %v451_v13  ;;  %320 = vmatprep.subr.bf16.mxu1 %v453_v14  ;;  %v363_v32 = vld [vmem:[%s649_s2] sm:$0xff]  ;;  %v483_v36 = vld [vmem:[%s647_s0 + $0x10c] ss:$16 sps:$4 sm:$0xff]   ;;  %v486_v41 = vld [vmem:[%s647_s0 + $0x108] ss:$16 sps:$4 sm:$0xff]  }
   0xd   :  { %428 = vmatprep.mubr.msk.bf16.mxu0 %vm254_vm0, %v493_v31  ;;  %430 = vmatprep.mubr.msk.bf16.mxu1 %vm254_vm0, %v493_v31  ;;  %v481_v35 = vld [vmem:[%s647_s0 + $0x104] ss:$16 sps:$4 sm:$0xff]   ;;  %v54_v38 = vld [vmem:[%s647_s0 + $0x128] sm:$0x77]  ;;  %v485_v40 = vld [vmem:[%s647_s0 + $0x100] ss:$16 sps:$4 sm:$0xff]  }
   0xe   :  { %v53_v37 = vld [vmem:[%s647_s0 + $0x120] sm:$0x77]  ;;  %367 = vperm.xlu0 %432, %v363_v32   ;;  %v364_v39 = vld [vmem:[%s649_s2 + $0x8] sm:$0xff]  ;;  %v426_v43 = vcombine.high %v54_v38, %v54_v38  ;;  %v425_v45 = vcombine.low %v54_v38, %v54_v38 }
   0xf   :  { %278 = vmatpush1.bf16.msra.mxu0 %v455_v15  ;;  %321 = vmatpush1.bf16.msra.mxu1 %v456_v16  ;;  %v424_v42 = vcombine.high %v53_v37, %v53_v37  ;;  %v423_v44 = vcombine.low %v53_v37, %v53_v37  ;;  %v491_v48 = vld [vmem:[%s648_s1] ss:$8 sps:$4 sm:$0xff]  }
  0x10   :  { %279 = vmatprep.subr.bf16.mxu0 %v457_v17  ;;  %322 = vmatprep.subr.bf16.mxu1 %v459_v18  ;;  %v266_v47 = vsel %vm258_vm1, %v425_v45, 0 }
  0x11   :  { %v260_v46 = vsel %vm258_vm1, %v423_v44, 0 }
  0x12   :  { %372 = vperm.xlu0 %432, %v364_v39  }
  0x13   :  { %280 = vmatpush1.bf16.msra.mxu0 %v461_v19  ;;  %323 = vmatpush1.bf16.msra.mxu1 %v462_v20 }
  0x14   :  { %281 = vmatprep.subr.bf16.mxu0 %v463_v21  ;;  %324 = vmatprep.subr.bf16.mxu1 %v465_v22 }
  0x17   :  { %282 = vmatpush1.bf16.msra.mxu0 %v467_v23  ;;  %325 = vmatpush1.bf16.msra.mxu1 %v468_v24 }
  0x18   :  { %283 = vmatprep.subr.bf16.mxu0 %v469_v25  ;;  %326 = vmatprep.subr.bf16.mxu1 %v471_v26 }
  0x1b   :  { %284 = vmatpush1.bf16.msra.mxu0 %v473_v27  ;;  %327 = vmatpush1.bf16.msra.mxu1 %v474_v28 }
  0x1c   :  { %285 = vmatprep.subr.bf16.mxu0 %v475_v29  ;;  %328 = vmatprep.subr.bf16.mxu1 %v477_v30 }
  0x1f   :  { %286 = vmatpush1.bf16.msra.mxu0 %v479_v33  ;;  %329 = vmatpush1.bf16.msra.mxu1 %v480_v34 }
  0x20   :  { %287 = vmatprep.subr.bf16.mxu0 %v481_v35  ;;  %330 = vmatprep.subr.bf16.mxu1 %v483_v36 }
  0x23   :  { %288 = vmatpush1.bf16.msra.mxu0 %v485_v40  ;;  %331 = vmatpush1.bf16.msra.mxu1 %v486_v41 }
  0x24   :  { %427 = vmatprep.subr.msk.bf16.mxu0 %vm258_vm1, %v424_v42  ;;  %429 = vmatprep.subr.msk.bf16.mxu1 %vm258_vm1, %v426_v43 }
  0x27   :  { %290 = vmatpush1.bf16.msra.mxu0 %v260_v46  ;;  %333 = vmatpush1.bf16.msra.mxu1 %v266_v47 }
  0x2a   :  { %304 = vmatmul.mubr.bf16.vlgmr.msra.gmra.mrb[0].mxu0 %v491_v48  ;;  %347 = vmatmul.mubr.bf16.vlgmr.msra.gmra.mrb[0].mxu1 %v491_v48 }
  0x8d   :  { %v368_v49 = vpop.permute.xlu0 %367 }
  0x91   :  { %v373_v1 = vpop.permute.xlu0 %372 }
  0xfd   :  { %v305_v50 = vpop.f32.mrb[0].mxu0  ;;  %v348_v51 = vpop.f32.mrb[0].mxu1 }
  0xfe   :  { %v307_v52 = vpop.f32.mrb[1].mxu0  ;;  %v350_v53 = vpop.f32.mrb[1].mxu1 }
  0xff   :  { %v357_v54 = vmax.f32 %v305_v50, %v307_v52  ;;  %v309_v55 = vpop.f32.mrb[2].mxu0  ;;  %v352_v56 = vpop.f32.mrb[2].mxu1 }
 0x100   :  { %v311_v57 = vpop.f32.mrb[3].mxu0  ;;  %v354_v58 = vpop.f32.mrb[3].mxu1 }
 0x101   :  { %v359_v59 = vmax.f32 %v357_v54, %v348_v51  ;;  %v358_v60 = vmax.f32 %v309_v55, %v311_v57 }
 0x103   :  { %v361_v61 = vmax.f32 %v359_v59, %v350_v53  ;;  %v360_v62 = vmax.f32 %v358_v60, %v352_v56 }
 0x105   :  { %v375_v63 = vadd.f32 %v368_v49, %v361_v61  ;;  %v362_v0 = vmax.f32 %v360_v62, %v354_v58 }
 0x107   :  { %v377_v2 = vmax.f32 %v375_v63, 0.0  ;;  %v376_v3 = vadd.f32 %v373_v1, %v362_v0 }
 0x109   :  { %v378_v4 = vmax.f32 %v376_v3, 0.0  ;;  %379 = vst [vmem:[%s650_s3] sm:$0xff] %v377_v2 }
 0x10b   :  { %380 = vst [vmem:[%s650_s3 + $0x8] sm:$0xff] %v378_v4 }

// kernel: lenet_forward.5
= control target key start
LH: loop header
LB: loop body
LE: loop exit
PB: predicated region body
PF: predicated region fallthrough
CT: control target
= control target key end

     0   :  { %v786_v1 = vmov 0   ;;  %v98_v20 = vlaneseq  ;;  %v787_v25 = vmov 1966171168   ;;  %vm264_vm0 = vcmask 130048   ;;  %s1005_s0 = inlined_call_operand.vmem [shape: bf16[2,400], index: 0, kind: input, shape index: {}]   ;;  %s1006_s1 = inlined_call_operand.vmem [shape: bf16[400,128], index: 1, kind: input, shape index: {}]   ;;  %s1007_s2 = inlined_call_operand.vmem [shape: f32[1,128], index: 2, kind: input, shape index: {}]   ;;  %s1008_s3 = inlined_call_operand.vmem [shape: bf16[128,128], index: 3, kind: input, shape index: {}]   ;;  %s1009_s4 = inlined_call_operand.vmem [shape: f32[1,128], index: 4, kind: input, shape index: {}]   ;;  %s1010_s5 = inlined_call_operand.vmem [shape: bf16[128,10], index: 5, kind: input, shape index: {}]   ;;  %s1011_s6 = inlined_call_operand.vmem [shape: f32[1,10], index: 6, kind: input, shape index: {}]   ;;  %s1012_s7 = inlined_call_operand.hbm [shape: f32[2,10], index: 7, kind: output, shape index: {}]  }
   0x1   :  { %v721_v0 = vld [vmem:[%s1006_s1 + $0x40] sm:$0xff]   ;;  %308 = vmatprep.subr.bf16.mxu1 %v786_v1  ;;  %v724_v4 = vld [vmem:[%s1006_s1 + $0x48] sm:$0xff]   ;;  %v727_v7 = vld [vmem:[%s1006_s1 + $0x50] sm:$0xff]   ;;  %v96_v26 = vunpack.c.l.s4 %v787_v25  ;;  %v788_v38 = vmov 0.0  }
   0x2   :  { %v722_v2 = vld [vmem:[%s1006_s1 + $0x80] sm:$0xff]   ;;  %636 = vmatprep.subr.bf16.mxu0 %v721_v0  ;;  %v725_v5 = vld [vmem:[%s1006_s1 + $0x88] sm:$0xff]   ;;  %v728_v8 = vld [vmem:[%s1006_s1 + $0x90] sm:$0xff]   ;;  %v99_v27 = vshrl.u32 %v98_v20, 7 }
   0x3   :  { %v723_v3 = vld [vmem:[%s1006_s1] sm:$0xff]   ;;  %309 = vmatpush1.bf16.msra.mxu1 %v722_v2  ;;  %v726_v6 = vld [vmem:[%s1006_s1 + $0x8] sm:$0xff]   ;;  %v729_v9 = vld [vmem:[%s1006_s1 + $0x10] sm:$0xff]   ;;  %v97_v30 = vunpack.c.0.s8 %v96_v26 }
   0x4   :  { %637 = vmatpush3.bf16.msra.mxu0 %v723_v3  ;;  %310 = vmatprep.subr.bf16.mxu1 %v786_v1  ;;  %v730_v10 = vld [vmem:[%s1006_s1 + $0x58] sm:$0xff]   ;;  %v733_v13 = vld [vmem:[%s1006_s1 + $0x60] sm:$0xff]   ;;  %v736_v16 = vld [vmem:[%s1006_s1 + $0x68] sm:$0xff]  }
   0x5   :  { %638 = vmatprep.subr.bf16.mxu0 %v724_v4  ;;  %v731_v11 = vld [vmem:[%s1006_s1 + $0x98] sm:$0xff]   ;;  %v734_v14 = vld [vmem:[%s1006_s1 + $0xa0] sm:$0xff]   ;;  %v737_v17 = vld [vmem:[%s1006_s1 + $0xa8] sm:$0xff]   ;;  %v100_v32 = vsub.s32 %v97_v30, %v99_v27 }
   0x6   :  { %v732_v12 = vld [vmem:[%s1006_s1 + $0x18] sm:$0xff]   ;;  %v735_v15 = vld [vmem:[%s1006_s1 + $0x20] sm:$0xff]   ;;  %v738_v18 = vld [vmem:[%s1006_s1 + $0x28] sm:$0xff]  }
   0x7   :  { %311 = vmatpush1.bf16.msra.mxu1 %v725_v5  ;;  %v739_v19 = vld [vmem:[%s1006_s1 + $0x70] sm:$0xff]   ;;  %v591_v23 = vld.sshfl [vmem:[%s1005_s0] sm:$0x33 pattern:$0x75316420]  ;;  %v742_v24 = vld [vmem:[%s1006_s1 + $0x78] sm:$0xff]  }
   0x8   :  { %639 = vmatpush3.bf16.msra.mxu0 %v726_v6  ;;  %312 = vmatprep.subr.bf16.mxu1 %v786_v1  ;;  %v740_v21 = vld [vmem:[%s1006_s1 + $0xb0] sm:$0xff]   ;;  %v743_v28 = vld [vmem:[%s1006_s1 + $0xb8] sm:$0xff]   ;;  %v94_v29 = vcombine.high %v591_v23, %v591_v23  ;;  %v745_v33 = vld [vmem:[%s1006_s1 + $0xc0] sm:$0xff]   ;;  %v101_v36 = vrot.slane %v591_v23, %v100_v32 }
   0x9   :  { %640 = vmatprep.subr.bf16.mxu0 %v727_v7  ;;  %v741_v22 = vld [vmem:[%s1006_s1 + $0x30] sm:$0xff]   ;;  %v744_v31 = vld [vmem:[%s1006_s1 + $0x38] sm:$0xff]   ;;  %v746_v34 = vld [vmem:[%s1008_s3] sm:$0xff]  }
   0xa   :  { %v108_v35 = vrot.slane %v94_v29, %v100_v32  ;;  %v109_v39 = vcombine.high %v101_v36, %v101_v36  ;;  %v747_v40 = vld [vmem:[%s1008_s3 + $0x8] sm:$0xff]  }
   0xb   :  { %313 = vmatpush1.bf16.msra.mxu1 %v728_v8 }
   0xc   :  { %641 = vmatpush3.bf16.msra.mxu0 %v729_v9  ;;  %314 = vmatprep.subr.bf16.mxu1 %v786_v1  ;;  %v110_v37 = vcombine.high %v108_v35, %v108_v35 }
   0xd   :  { %642 = vmatprep.subr.bf16.mxu0 %v730_v10  ;;  %300 = vmatprep.mubr.bf16.mxu0 %v108_v35 }
   0xe   :  { %617 = vmatprep.mubr.msk.bf16.mxu1 %vm264_vm0, %v110_v37 }
   0xf   :  { %315 = vmatpush1.bf16.msra.mxu1 %v731_v11 }
  0x10   :  { %643 = vmatpush3.bf16.msra.mxu0 %v732_v12  ;;  %316 = vmatprep.subr.bf16.mxu1 %v786_v1 }
  0x11   :  { %644 = vmatprep.subr.bf16.mxu0 %v733_v13 }
  0x13   :  { %317 = vmatpush1.bf16.msra.mxu1 %v734_v14 }
  0x14   :  { %645 = vmatpush3.bf16.msra.mxu0 %v735_v15  ;;  %318 = vmatprep.subr.bf16.mxu1 %v786_v1 }
  0x15   :  { %646 = vmatprep.subr.bf16.mxu0 %v736_v16 }
  0x17   :  { %319 = vmatpush1.bf16.msra.mxu1 %v737_v17 }
  0x18   :  { %647 = vmatpush3.bf16.msra.mxu0 %v738_v18  ;;  %320 = vmatprep.subr.bf16.mxu1 %v786_v1 }
  0x19   :  { %648 = vmatprep.subr.bf16.mxu0 %v739_v19 }
  0x1b   :  { %321 = vmatpush1.bf16.msra.mxu1 %v740_v21 }
  0x1c   :  { %649 = vmatpush3.bf16.msra.mxu0 %v741_v22  ;;  %322 = vmatprep.subr.bf16.mxu1 %v786_v1 }
  0x1d   :  { %650 = vmatprep.subr.bf16.mxu0 %v742_v24 }
  0x1f   :  { %323 = vmatpush1.bf16.msra.mxu1 %v743_v28 }
  0x20   :  { %651 = vmatpush3.bf16.msra.mxu0 %v744_v31  ;;  %324 = vmatprep.subr.bf16.mxu1 %v786_v1 }
  0x21   :  { %676 = vmatprep.subr.bf16.mxu0 %v788_v38 }
  0x23   :  { %301 = vmatmul.mubr.bf16.vlgmr.msra.gmra.mrb[0].mxu0 %v101_v36  ;;  %325 = vmatpush1.bf16.msra.mxu1 %v745_v33 }
  0x24   :  { %677 = vmatpush3.bf16.msra.mxu0 %v746_v34  ;;  %696 = vmatprep.subr.bf16.mxu1 %v788_v38 }
  0x25   :  { %678 = vmatprep.subr.bf16.mxu0 %v788_v38 }
  0x26   :  { %341 = vmatmul.mubr.bf16.vlgmr.msra.gmra.mrb[0].mxu1 %v109_v39 }
  0x27   :  { %12 = vsyncpa [#allocation3], 0  ;;  %v748_v41 = vld [vmem:[%s1008_s3 + $0x10] sm:$0xff]   ;;  %v749_v42 = vld [vmem:[%s1008_s3 + $0x18] sm:$0xff]   ;;  %vm789_vm1 = vmmov 0   ;;  %s790_s16 = smov [#allocation2]  }
  0x28   :  { %679 = vmatpush3.bf16.msra.mxu0 %v747_v40  ;;  %v750_v43 = vld [vmem:[%s1008_s3 + $0x20] sm:$0xff]   ;;  %v751_v44 = vld [vmem:[%s1008_s3 + $0x28] sm:$0xff]   ;;  %v752_v45 = vld [vmem:[%s1008_s3 + $0x30] sm:$0xff]   ;;  %692 = vmatprep.mubr.msk.bf16.mxu0 %vm789_vm1, %v788_v38  ;;  %s582_s17 = sshll.u32 %s790_s16, 4  ;;  %vm574_vm2 = vcmask 74752   ;;  %s583_s17 = int_to_ptr.vmem [resolvable:$true] %s582_s17 }
  0x29   :  { %680 = vmatprep.subr.bf16.mxu0 %v788_v38  ;;  %v753_v46 = vld [vmem:[%s1008_s3 + $0x38] sm:$0xff]   ;;  %712 = vmatprep.mubr.msk.bf16.mxu1 %vm789_vm1, %v788_v38  ;;  %v754_v47 = vld [vmem:[%s1010_s5] sm:$0xff]   ;;  %v755_v48 = vld [vmem:[%s1010_s5 + $0x8] sm:$0xff]   ;;  %p767_p1 = scmp.lt.s32.totalorder %s583_s17, %s583_s17 }
  0x2a   :  { %697 = vmatpush3.bf16.msra.mxu1 %v754_v47  ;;  %v756_v49 = vld [vmem:[%s1010_s5 + $0x10] sm:$0xff]   ;;  %v757_v50 = vld [vmem:[%s1010_s5 + $0x18] sm:$0xff]   ;;  %v758_v51 = vld [vmem:[%s1010_s5 + $0x20] sm:$0xff]  }
  0x2b   :  { %698 = vmatprep.subr.bf16.mxu1 %v788_v38  ;;  %v759_v52 = vld [vmem:[%s1010_s5 + $0x28] sm:$0xff]   ;;  %v590_v55 = vld [vmem:[%s1007_s2] ss:$0 sm:$0xff]  ;;  %v760_v3 = vld [vmem:[%s1010_s5 + $0x30] sm:$0xff]  }
  0x2c   :  { %681 = vmatpush3.bf16.msra.mxu0 %v748_v41  ;;  %v761_v4 = vld [vmem:[%s1010_s5 + $0x38] sm:$0xff]   ;;  %v618_v5 = vld [vmem:[%s1009_s4] ss:$0 sm:$0xff]  ;;  %s762_s4 = scalar_lea.vmem %s583_s17, 32 }
  0x2d   :  { %682 = vmatprep.subr.bf16.mxu0 %v788_v38  ;;  %v627_v13 = vld [vmem:[%s1011_s6] ss:$0 sm:$0xff]  ;;  %p763_p0 = scmp.ne.s32.totalorder %s583_s17, %s762_s4  ;;  %p768_p2 = scmp.lt.s32.totalorder %s762_s4, %s762_s4 }
  0x2e   :  { %699 = vmatpush3.bf16.msra.mxu1 %v755_v48 }
  0x2f   :  { %700 = vmatprep.subr.bf16.mxu1 %v788_v38  ;;  %p769_p3 = por %p768_p2, %p767_p1 }
  0x30   :  { %683 = vmatpush3.bf16.msra.mxu0 %v749_v42 }
  0x31   :  { %684 = vmatprep.subr.bf16.mxu0 %v788_v38  ;;  %p770_p4 = pnand %p769_p3, %p763_p0 }
  0x32   :  { %701 = vmatpush3.bf16.msra.mxu1 %v756_v49 }
  0x33   :  { %702 = vmatprep.subr.bf16.mxu1 %v788_v38 }
  0x34   :  { %685 = vmatpush3.bf16.msra.mxu0 %v750_v43 }
  0x35   :  { %686 = vmatprep.subr.bf16.mxu0 %v788_v38 }
  0x36   :  { %703 = vmatpush3.bf16.msra.mxu1 %v757_v50 }
  0x37   :  { %704 = vmatprep.subr.bf16.mxu1 %v788_v38 }
  0x38   :  { %687 = vmatpush3.bf16.msra.mxu0 %v751_v44 }
  0x39   :  { %688 = vmatprep.subr.bf16.mxu0 %v788_v38 }
  0x3a   :  { %705 = vmatpush3.bf16.msra.mxu1 %v758_v51 }
  0x3b   :  { %706 = vmatprep.subr.bf16.mxu1 %v788_v38 }
  0x3c   :  { %689 = vmatpush3.bf16.msra.mxu0 %v752_v45 }
  0x3d   :  { %690 = vmatprep.subr.bf16.mxu0 %v788_v38 }
  0x3e   :  { %707 = vmatpush3.bf16.msra.mxu1 %v759_v52 }
  0x3f   :  { %708 = vmatprep.subr.bf16.mxu1 %v788_v38 }
  0x40   :  { %691 = vmatpush3.bf16.msra.mxu0 %v753_v46 }
  0x42   :  { %709 = vmatpush3.bf16.msra.mxu1 %v760_v3 }
  0x43   :  { %710 = vmatprep.subr.bf16.mxu1 %v788_v38 }
  0x46   :  { %711 = vmatpush3.bf16.msra.mxu1 %v761_v4 }
  0xf6   :  { %v652_v53 = vpop.f32.mrb[0].mxu0 }
  0xf7   :  { %v653_v54 = vpop.f32.mrb[1].mxu0 }
  0xf8   :  { %v654_v56 = vadd.f32 %v653_v54, %v652_v53  ;;  %v655_v57 = vpop.f32.mrb[2].mxu0 }
  0xf9   :  { %v656_v58 = vpop.f32.mrb[3].mxu0  ;;  %v342_v59 = vpop.f32.mrb[0].mxu1 }
  0xfa   :  { %v303_v60 = vadd.f32 %v654_v56, %v590_v55  ;;  %v344_v61 = vpop.f32.mrb[1].mxu1 }
  0xfb   :  { %v345_v62 = vpop.f32.mrb[2].mxu1 }
  0xfc   :  { %v343_v63 = vadd.f32 %v342_v59, %v303_v60  ;;  %v346_v0 = vpop.f32.mrb[3].mxu1 }
  0xfe   :  { %v348_v1 = vmax.f32 %v343_v63, 0.0 }
 0x100   :  { %v349_v2 = vpack.c.bf16 %v348_v1, %v348_v1 }
 0x102   :  { %693 = vmatmul.mubr.bf16.vlgmr.msra.gmra.mrb[4].mxu0 %v349_v2 }
 0x1d5   :  { %v455_v6 = vpop.f32.mrb[4].mxu0 }
 0x1d6   :  { %v456_v7 = vadd.f32 %v618_v5, %v455_v6  ;;  %v694_v8 = vpop.f32.mrb[5].mxu0 }
 0x1d7   :  { %v458_v9 = vpop.f32.mrb[6].mxu0 }
 0x1d8   :  { %v461_v10 = vmax.f32 %v456_v7, 0.0  ;;  %v695_v11 = vpop.f32.mrb[7].mxu0 }
 0x1da   :  { %v462_v12 = vpack.c.bf16 %v461_v10, %v461_v10 }
 0x1dc   :  { %713 = vmatmul.mubr.bf16.vlgmr.msra.gmra.mrb[4].mxu1 %v462_v12 }
 0x2af   :  { %v568_v14 = vpop.f32.mrb[4].mxu1 }
 0x2b0   :  { %v569_v15 = vadd.f32 %v627_v13, %v568_v14  ;;  %v714_v16 = vpop.f32.mrb[5].mxu1 }
 0x2b1   :  { %v571_v17 = vpop.f32.mrb[6].mxu1 }
 0x2b2   :  { %v715_v18 = vpop.f32.mrb[7].mxu1  ;;  %575 = vst.msk [vmem:[#allocation2] sm:$0x3] %vm574_vm2, %v569_v15 }
 0x2b3   :  { %773 = shalt.err (!%p770_p4)
}
 0x2b4   :  { %s774_s6 = scalar_lea.hbm %s1012_s7, 32 }
 0x2b5   :  { %p775_p5 = scmp.ne.s32.totalorder %s1012_s7, %s774_s6  ;;  %p778_p6 = scmp.lt.u32.totalorder %s774_s6, %s1012_s7 }
 0x2b7   :  { %p780_p7 = pnand %p778_p6, %p775_p5 }
 0x2b9   :  { %783 = shalt.err (!%p780_p7)
}
 0x2ba   :  { %585 = dma.vmem_to_hbm [thread:$0]  %s583_s17, 32, %s1012_s7, [#allocation3]  }
 0x2bb   :  { %784 = dma.done.wait [#allocation3], 32  }
 0x2bc   :  { %785 = vsyncadd [#allocation3], 4294967264 }
 0x2bd   :  { %589 = vsyncpa [#allocation3], 1 }

</bundles_post_ra>
